<compile_context>
chip_gen: v7x
topology: tpu7x:2x2x1
jax: 0.10.0
libtpu: 0.0.40
codegen_flags: <defaults>
</compile_context>

<pallas_src>
import functools
import math

import jax
import jax.numpy as jnp
from jax.experimental import pallas as pl
from jax.experimental.pallas import tpu as pltpu

_INV_SQRT2 = 1.0 / math.sqrt(2.0)


def _gelu(h, *, approximate):
    if approximate:
        # tanh-form GELU: tanh goes to the EUP slot (off the VALU).
        # ~1e-3 relative deviation from torch.nn.GELU()'s exact-erf default.
        return jax.nn.gelu(h, approximate=True)
    # Exact-erf GELU: matches torch.nn.GELU() default.
    return 0.5 * h * (1.0 + jax.lax.erf(h * _INV_SQRT2))


def _mixer_kernel(x_ref, w1_ref, b1_ref, w2_ref, b2_ref, o_ref, *, approximate_gelu):
    # x_ref : (S, tn)    lane tile of the [S, N = B*D] slab (last tile may be ragged)
    # w1_ref: (d_ff, S)  torch Linear(seq_len -> d_ff) weight, cast to x.dtype
    # b1_ref: (d_ff, 1)  f32
    # w2_ref: (S, d_ff)  torch Linear(d_ff -> seq_len) weight, cast to x.dtype
    # b2_ref: (S, 1)     f32
    x = x_ref[...]
    h = jnp.dot(w1_ref[...], x, preferred_element_type=jnp.float32) + b1_ref[...]
    # GELU in the activation dtype: f32 inputs keep exact-erf f32 (torch parity);
    # bf16 inputs run GELU on the bf16 VALU (v6e/v7x, 2x) -- the result is cast
    # to x.dtype for the second matmul anyway, so the precision class is the same.
    h = _gelu(h.astype(x.dtype), approximate=approximate_gelu)
    y = jnp.dot(w2_ref[...], h, preferred_element_type=jnp.float32) + b2_ref[...]
    o_ref[...] = y.astype(o_ref.dtype)


def _round_up(a, b):
    return (a + b - 1) // b * b


def _vmem_capacity_bytes():
    try:
        return int(pltpu.get_tpu_info().vmem_capacity_bytes)
    except Exception:
        return 64 * 1024 * 1024  # conservative fallback (v7x per-TensorCore)


def _select_tile_n(S, d_ff, N, itemsize, budget_bytes):
    """Largest 128-multiple lane tile that fits the VMEM budget.

    Prefers >= 2 grid steps so `dimension_semantics=("parallel",)` can shard the
    lane axis across v7x's two TensorCores (one extra ~0.35us step is free on
    single-TC v5e/v6e).
    """
    if N <= 128:
        return N  # single full-extent block (lane tiles below 128 are not legal)

    # Grid-constant, single-buffered weight/bias blocks (biases pad to 128 lanes).
    fixed = 2 * d_ff * S * itemsize + (d_ff + _round_up(S, 8)) * 128 * 4

    def per_step(tn):
        io = 2 * 2 * S * tn * itemsize                    # double-buffered in + out tiles
        inter = d_ff * tn * (4 + itemsize) + S * tn * 4   # H f32 + H cast + Y f32
        return io + inter

    max_tn = min(max(128, _round_up(pl.cdiv(N, 2), 128)),  # keep >= 2 steps
                 (N // 128) * 128)                          # never exceed the array
    tn = 128
    for cand in (2048, 1024, 512, 256, 128):
        if cand <= max_tn and fixed + per_step(cand) <= budget_bytes:
            tn = cand
            break
    return tn


def mlp_mixer_forward(x, w1, b1, w2, b2, *, tile_n=None, approximate_gelu=False):
    """MLP-Mixer token-mixing forward.

    x : [seq_len, batch, d_model]
    w1: [d_ff, seq_len], b1: [d_ff]     (torch Linear(seq_len -> d_ff))
    w2: [seq_len, d_ff], b2: [seq_len]  (torch Linear(d_ff -> seq_len))
    returns [seq_len, batch, d_model]
    """
    S, B, D = x.shape
    d_ff = w1.shape[0]
    assert w1.shape == (d_ff, S) and b1.shape == (d_ff,)
    assert w2.shape == (S, d_ff) and b2.shape == (S,)
    N = B * D
    itemsize = jnp.dtype(x.dtype).itemsize

    # Both MXU operands in the activation dtype (bf16 x => genuinely bf16 matmuls,
    # f32 accumulation) and half the weight DMA / VMEM vs keeping f32 weights.
    w1 = w1.astype(x.dtype)
    w2 = w2.astype(x.dtype)
    b1c = b1.reshape(d_ff, 1).astype(jnp.float32)
    b2c = b2.reshape(S, 1).astype(jnp.float32)

    # [S, B, D] -> [S, N]: pure reshape, no HBM transpose.
    x2d = x.reshape(S, N)

    vmem_cap = _vmem_capacity_bytes()
    # ~100 MiB scoped limit on v5e/v6e (128 MiB physical), ~56 MiB on v7x (64 MiB/TC).
    vmem_limit = max(32 << 20, min(vmem_cap - (8 << 20), 100 << 20))

    if tile_n is None:
        tn = _select_tile_n(S, d_ff, N, itemsize, int(vmem_limit * 0.8))
    elif N <= 128:
        tn = N
    else:
        tn = max(128, min(_round_up(tile_n, 128), (N // 128) * 128))
    n_steps = pl.cdiv(N, tn)

    kernel = functools.partial(_mixer_kernel, approximate_gelu=approximate_gelu)
    params = pltpu.CompilerParams(
        dimension_semantics=("parallel",),
        vmem_limit_bytes=int(vmem_limit),
    )
    cost = pl.CostEstimate(
        flops=4 * d_ff * S * N,
        transcendentals=d_ff * N,
        bytes_accessed=(2 * S * N + 2 * S * d_ff) * itemsize + (d_ff + S) * 4,
    )

    def _call(single_buffer_weights):
        # Grid-constant operands (index_map -> (0,0)); single-buffer them so the
        # pipeline doesn't allocate 2x VMEM for blocks that never change.
        wkw = {"pipeline_mode": pl.Buffered(1)} if single_buffer_weights else {}
        grid_spec = pltpu.PrefetchScalarGridSpec(
            num_scalar_prefetch=0,
            grid=(n_steps,),
            in_specs=[
                pl.BlockSpec((S, tn), lambda i: (0, i)),
                pl.BlockSpec((d_ff, S), lambda i: (0, 0), **wkw),
                pl.BlockSpec((d_ff, 1), lambda i: (0, 0), **wkw),
                pl.BlockSpec((S, d_ff), lambda i: (0, 0), **wkw),
                pl.BlockSpec((S, 1), lambda i: (0, 0), **wkw),
            ],
            # Ragged last N-block (if N % tn != 0) is handled by Pallas with a
            # masked store; garbage in padded input lanes is safe ONLY because
            # nothing reduces over the lane (N) axis in this kernel.
            out_specs=pl.BlockSpec((S, tn), lambda i: (0, i)),
        )
        return pl.pallas_call(
            kernel,
            out_shape=jax.ShapeDtypeStruct((S, N), x.dtype),
            grid_spec=grid_spec,
            compiler_params=params,
            cost_estimate=cost,
        )(x2d, w1, b1c, w2, b2c)

    try:
        out2d = _call(single_buffer_weights=True)
    except Exception:
        # Compatibility fallback if pl.Buffered(1) is rejected by this jax build.
        out2d = _call(single_buffer_weights=False)

    # [S, N] -> [S, B, D]: pure reshape again, no transpose.
    return out2d.reshape(S, B, D)


def _reference(x, w1, b1, w2, b2, *, approximate_gelu=False):
    xt = jnp.transpose(x, (2, 1, 0)).astype(jnp.float32)          # [D, B, S]
    w1f = w1.astype(x.dtype).astype(jnp.float32)                  # match kernel rounding
    w2f = w2.astype(x.dtype).astype(jnp.float32)
    h = jnp.einsum("dbs,fs->dbf", xt, w1f) + b1
    h = _gelu(h.astype(x.dtype).astype(jnp.float32), approximate=approximate_gelu)
    y = jnp.einsum("dbf,sf->dbs", h, w2f) + b2
    return jnp.transpose(y, (2, 1, 0))                            # [S, B, D]


def _make_inputs(key, seq_len, batch, d_model, d_ff, dtype):
    kx, k1, k2, k3, k4 = jax.random.split(key, 5)
    x = jax.random.normal(kx, (seq_len, batch, d_model), jnp.float32).astype(dtype)
    s1 = 1.0 / math.sqrt(seq_len)
    s2 = 1.0 / math.sqrt(d_ff)
    w1 = jax.random.uniform(k1, (d_ff, seq_len), jnp.float32, -s1, s1)
    b1 = jax.random.uniform(k2, (d_ff,), jnp.float32, -s1, s1)
    w2 = jax.random.uniform(k3, (seq_len, d_ff), jnp.float32, -s2, s2)
    b2 = jax.random.uniform(k4, (seq_len,), jnp.float32, -s2, s2)
    return x, w1, b1, w2, b2


if __name__ == "__main__":
    key = jax.random.PRNGKey(0)
    k_a, k_b, k_c = jax.random.split(key, 3)

    # Case 1: small shapes, single full-extent lane block (N = 32 <= 128), exact erf.
    S, B, D, F = 8, 2, 16, 32
    x, w1, b1, w2, b2 = _make_inputs(k_a, S, B, D, F, jnp.float32)
    out = jax.block_until_ready(mlp_mixer_forward(x, w1, b1, w2, b2))
    ref = _reference(x, w1, b1, w2, b2)
    assert out.shape == (S, B, D)
    assert jnp.allclose(out, ref, atol=1e-5, rtol=1e-5)

    # Case 1b: tanh-approx GELU path (EUP slot) against a tanh reference.
    out = jax.block_until_ready(
        mlp_mixer_forward(x, w1, b1, w2, b2, approximate_gelu=True))
    ref = _reference(x, w1, b1, w2, b2, approximate_gelu=True)
    assert jnp.allclose(out, ref, atol=1e-5, rtol=1e-5)

    # Case 2: ragged lane tiling (N = 160 -> two 128-lane tiles, masked last store),
    # no HBM pad/slice round-trip.
    S, B, D, F = 8, 2, 80, 32
    x, w1, b1, w2, b2 = _make_inputs(k_b, S, B, D, F, jnp.float32)
    out = jax.block_until_ready(mlp_mixer_forward(x, w1, b1, w2, b2))
    ref = _reference(x, w1, b1, w2, b2)
    assert out.shape == (S, B, D)
    assert jnp.allclose(out, ref, atol=1e-5, rtol=1e-5)

    # Case 3: bf16 activations + bf16-cast weights (native bf16 MXU, bf16 GELU).
    S, B, D, F = 16, 2, 64, 32
    x, w1, b1, w2, b2 = _make_inputs(k_c, S, B, D, F, jnp.bfloat16)
    out = jax.block_until_ready(mlp_mixer_forward(x, w1, b1, w2, b2))
    ref = _reference(x, w1, b1, w2, b2)
    assert out.shape == (S, B, D) and out.dtype == jnp.bfloat16
    assert jnp.allclose(out.astype(jnp.float32), ref, atol=5e-2, rtol=5e-2)

    print("KERNEL_OK")
</pallas_src>

<mosaic_0001>
module attributes {stable_mosaic.version = 11 : i64} {
  func.func @_mixer_kernel(%arg0: i32, %arg1: memref<8x32xf32, #tpu.memory_space<vmem>>, %arg2: memref<32x8xf32, #tpu.memory_space<vmem>>, %arg3: memref<32x1xf32, #tpu.memory_space<vmem>>, %arg4: memref<8x32xf32, #tpu.memory_space<vmem>>, %arg5: memref<8x1xf32, #tpu.memory_space<vmem>>, %arg6: memref<8x32xf32, #tpu.memory_space<vmem>>) attributes {dimension_semantics = [#tpu.dimension_semantics<parallel>], iteration_bounds = array<i64: 1>, scalar_prefetch = 0 : i64, scratch_operands = 0 : i64, tpu.core_type = #tpu.core_type<tc>, window_params = [{transform_indices = @transform_0, window_bounds = array<i64: 8, 32>}, {pipeline_mode = #tpu.pipeline_mode<synchronous>, transform_indices = @transform_1, window_bounds = array<i64: 32, 8>}, {pipeline_mode = #tpu.pipeline_mode<synchronous>, transform_indices = @transform_2, window_bounds = array<i64: 32, 1>}, {pipeline_mode = #tpu.pipeline_mode<synchronous>, transform_indices = @transform_3, window_bounds = array<i64: 8, 32>}, {pipeline_mode = #tpu.pipeline_mode<synchronous>, transform_indices = @transform_4, window_bounds = array<i64: 8, 1>}, {transform_indices = @transform_5, window_bounds = array<i64: 8, 32>}]} {
    %c0 = arith.constant 0 : index
    %c0_0 = arith.constant 0 : index
    %0 = vector.load %arg1[%c0, %c0_0] : memref<8x32xf32, #tpu.memory_space<vmem>>, vector<8x32xf32>
    %c0_1 = arith.constant 0 : index
    %c0_2 = arith.constant 0 : index
    %1 = vector.load %arg2[%c0_1, %c0_2] : memref<32x8xf32, #tpu.memory_space<vmem>>, vector<32x8xf32>
    %cst = arith.constant dense<0.000000e+00> : vector<32x32xf32>
    %2 = tpu.matmul %1, %0, %cst {dimension_numbers = #tpu.dot_dimension_numbers<[1], [0], [0], [1], [0, 0, 1, 1], [], []>} : vector<32x8xf32>, vector<8x32xf32>, vector<32x32xf32> -> vector<32x32xf32>
    %c0_3 = arith.constant 0 : index
    %c0_4 = arith.constant 0 : index
    %3 = vector.load %arg3[%c0_3, %c0_4] : memref<32x1xf32, #tpu.memory_space<vmem>>, vector<32x1xf32>
    %4 = vector.broadcast %3 : vector<32x1xf32> to vector<32x32xf32>
    %5 = arith.addf %2, %4 : vector<32x32xf32>
    %cst_5 = arith.constant 5.000000e-01 : f32
    %6 = vector.broadcast %cst_5 : f32 to vector<32x32xf32>
    %7 = arith.mulf %6, %5 : vector<32x32xf32>
    %cst_6 = arith.constant 0.707106769 : f32
    %8 = vector.broadcast %cst_6 : f32 to vector<32x32xf32>
    %9 = arith.mulf %5, %8 : vector<32x32xf32>
    %10 = math.erf %9 : vector<32x32xf32>
    %cst_7 = arith.constant 1.000000e+00 : f32
    %11 = vector.broadcast %cst_7 : f32 to vector<32x32xf32>
    %12 = arith.addf %11, %10 : vector<32x32xf32>
    %13 = arith.mulf %7, %12 : vector<32x32xf32>
    %c0_8 = arith.constant 0 : index
    %c0_9 = arith.constant 0 : index
    %14 = vector.load %arg4[%c0_8, %c0_9] : memref<8x32xf32, #tpu.memory_space<vmem>>, vector<8x32xf32>
    %cst_10 = arith.constant dense<0.000000e+00> : vector<8x32xf32>
    %15 = tpu.matmul %14, %13, %cst_10 {dimension_numbers = #tpu.dot_dimension_numbers<[1], [0], [0], [1], [0, 0, 1, 1], [], []>} : vector<8x32xf32>, vector<32x32xf32>, vector<8x32xf32> -> vector<8x32xf32>
    %c0_11 = arith.constant 0 : index
    %c0_12 = arith.constant 0 : index
    %16 = vector.load %arg5[%c0_11, %c0_12] : memref<8x1xf32, #tpu.memory_space<vmem>>, vector<8x1xf32>
    %17 = vector.broadcast %16 : vector<8x1xf32> to vector<8x32xf32>
    %18 = arith.addf %15, %17 : vector<8x32xf32>
    %c0_13 = arith.constant 0 : index
    %c0_14 = arith.constant 0 : index
    %19 = vector.load %arg6[%c0_13, %c0_14] : memref<8x32xf32, #tpu.memory_space<vmem>>, vector<8x32xf32>
    tpu.vector_store %arg6[%c0_13, %c0_14], %18 {strides = array<i32>} : memref<8x32xf32, #tpu.memory_space<vmem>>, vector<8x32xf32>,
    return
  }
  func.func @transform_0(%arg0: i32) -> (i32, i32) {
    %c0_i32 = arith.constant 0 : i32
    %c0_i32_0 = arith.constant 0 : i32
    return %c0_i32, %arg0 : i32, i32
  }
  func.func @transform_1(%arg0: i32) -> (i32, i32) {
    %c0_i32 = arith.constant 0 : i32
    %c0_i32_0 = arith.constant 0 : i32
    %c0_i32_1 = arith.constant 0 : i32
    return %c0_i32, %c0_i32_0 : i32, i32
  }
  func.func @transform_2(%arg0: i32) -> (i32, i32) {
    %c0_i32 = arith.constant 0 : i32
    %c0_i32_0 = arith.constant 0 : i32
    %c0_i32_1 = arith.constant 0 : i32
    return %c0_i32, %c0_i32_0 : i32, i32
  }
  func.func @transform_3(%arg0: i32) -> (i32, i32) {
    %c0_i32 = arith.constant 0 : i32
    %c0_i32_0 = arith.constant 0 : i32
    %c0_i32_1 = arith.constant 0 : i32
    return %c0_i32, %c0_i32_0 : i32, i32
  }
  func.func @transform_4(%arg0: i32) -> (i32, i32) {
    %c0_i32 = arith.constant 0 : i32
    %c0_i32_0 = arith.constant 0 : i32
    %c0_i32_1 = arith.constant 0 : i32
    return %c0_i32, %c0_i32_0 : i32, i32
  }
  func.func @transform_5(%arg0: i32) -> (i32, i32) {
    %c0_i32 = arith.constant 0 : i32
    %c0_i32_0 = arith.constant 0 : i32
    return %c0_i32, %arg0 : i32, i32
  }
}

module attributes {stable_mosaic.version = 11 : i64} {
  func.func @_mixer_kernel(%arg0: i32, %arg1: memref<8x32xf32, #tpu.memory_space<vmem>>, %arg2: memref<32x8xf32, #tpu.memory_space<vmem>>, %arg3: memref<32x1xf32, #tpu.memory_space<vmem>>, %arg4: memref<8x32xf32, #tpu.memory_space<vmem>>, %arg5: memref<8x1xf32, #tpu.memory_space<vmem>>, %arg6: memref<8x32xf32, #tpu.memory_space<vmem>>) attributes {dimension_semantics = [#tpu.dimension_semantics<parallel>], iteration_bounds = array<i64: 1>, scalar_prefetch = 0 : i64, scratch_operands = 0 : i64, tpu.core_type = #tpu.core_type<tc>, window_params = [{transform_indices = @transform_0, window_bounds = array<i64: 8, 32>}, {pipeline_mode = #tpu.pipeline_mode<synchronous>, transform_indices = @transform_1, window_bounds = array<i64: 32, 8>}, {pipeline_mode = #tpu.pipeline_mode<synchronous>, transform_indices = @transform_2, window_bounds = array<i64: 32, 1>}, {pipeline_mode = #tpu.pipeline_mode<synchronous>, transform_indices = @transform_3, window_bounds = array<i64: 8, 32>}, {pipeline_mode = #tpu.pipeline_mode<synchronous>, transform_indices = @transform_4, window_bounds = array<i64: 8, 1>}, {transform_indices = @transform_5, window_bounds = array<i64: 8, 32>}]} {
    %c0 = arith.constant 0 : index
    %c0_0 = arith.constant 0 : index
    %0 = vector.load %arg1[%c0, %c0_0] : memref<8x32xf32, #tpu.memory_space<vmem>>, vector<8x32xf32>
    %c0_1 = arith.constant 0 : index
    %c0_2 = arith.constant 0 : index
    %1 = vector.load %arg2[%c0_1, %c0_2] : memref<32x8xf32, #tpu.memory_space<vmem>>, vector<32x8xf32>
    %cst = arith.constant dense<0.000000e+00> : vector<32x32xf32>
    %2 = tpu.matmul %1, %0, %cst {dimension_numbers = #tpu.dot_dimension_numbers<[1], [0], [0], [1], [0, 0, 1, 1], [], []>} : vector<32x8xf32>, vector<8x32xf32>, vector<32x32xf32> -> vector<32x32xf32>
    %c0_3 = arith.constant 0 : index
    %c0_4 = arith.constant 0 : index
    %3 = vector.load %arg3[%c0_3, %c0_4] : memref<32x1xf32, #tpu.memory_space<vmem>>, vector<32x1xf32>
    %4 = vector.broadcast %3 : vector<32x1xf32> to vector<32x32xf32>
    %5 = arith.addf %2, %4 : vector<32x32xf32>
    %cst_5 = arith.constant 5.000000e-01 : f32
    %6 = vector.broadcast %cst_5 : f32 to vector<32x32xf32>
    %7 = arith.mulf %6, %5 : vector<32x32xf32>
    %cst_6 = arith.constant 0.707106769 : f32
    %8 = vector.broadcast %cst_6 : f32 to vector<32x32xf32>
    %9 = arith.mulf %5, %8 : vector<32x32xf32>
    %10 = math.erf %9 : vector<32x32xf32>
    %cst_7 = arith.constant 1.000000e+00 : f32
    %11 = vector.broadcast %cst_7 : f32 to vector<32x32xf32>
    %12 = arith.addf %11, %10 : vector<32x32xf32>
    %13 = arith.mulf %7, %12 : vector<32x32xf32>
    %c0_8 = arith.constant 0 : index
    %c0_9 = arith.constant 0 : index
    %14 = vector.load %arg4[%c0_8, %c0_9] : memref<8x32xf32, #tpu.memory_space<vmem>>, vector<8x32xf32>
    %cst_10 = arith.constant dense<0.000000e+00> : vector<8x32xf32>
    %15 = tpu.matmul %14, %13, %cst_10 {dimension_numbers = #tpu.dot_dimension_numbers<[1], [0], [0], [1], [0, 0, 1, 1], [], []>} : vector<8x32xf32>, vector<32x32xf32>, vector<8x32xf32> -> vector<8x32xf32>
    %c0_11 = arith.constant 0 : index
    %c0_12 = arith.constant 0 : index
    %16 = vector.load %arg5[%c0_11, %c0_12] : memref<8x1xf32, #tpu.memory_space<vmem>>, vector<8x1xf32>
    %17 = vector.broadcast %16 : vector<8x1xf32> to vector<8x32xf32>
    %18 = arith.addf %15, %17 : vector<8x32xf32>
    %c0_13 = arith.constant 0 : index
    %c0_14 = arith.constant 0 : index
    %19 = vector.load %arg6[%c0_13, %c0_14] : memref<8x32xf32, #tpu.memory_space<vmem>>, vector<8x32xf32>
    tpu.vector_store %arg6[%c0_13, %c0_14], %18 {strides = array<i32>} : memref<8x32xf32, #tpu.memory_space<vmem>>, vector<8x32xf32>,
    return
  }
  func.func @transform_0(%arg0: i32) -> (i32, i32) {
    %c0_i32 = arith.constant 0 : i32
    %c0_i32_0 = arith.constant 0 : i32
    return %c0_i32, %arg0 : i32, i32
  }
  func.func @transform_1(%arg0: i32) -> (i32, i32) {
    %c0_i32 = arith.constant 0 : i32
    %c0_i32_0 = arith.constant 0 : i32
    %c0_i32_1 = arith.constant 0 : i32
    return %c0_i32, %c0_i32_0 : i32, i32
  }
  func.func @transform_2(%arg0: i32) -> (i32, i32) {
    %c0_i32 = arith.constant 0 : i32
    %c0_i32_0 = arith.constant 0 : i32
    %c0_i32_1 = arith.constant 0 : i32
    return %c0_i32, %c0_i32_0 : i32, i32
  }
  func.func @transform_3(%arg0: i32) -> (i32, i32) {
    %c0_i32 = arith.constant 0 : i32
    %c0_i32_0 = arith.constant 0 : i32
    %c0_i32_1 = arith.constant 0 : i32
    return %c0_i32, %c0_i32_0 : i32, i32
  }
  func.func @transform_4(%arg0: i32) -> (i32, i32) {
    %c0_i32 = arith.constant 0 : i32
    %c0_i32_0 = arith.constant 0 : i32
    %c0_i32_1 = arith.constant 0 : i32
    return %c0_i32, %c0_i32_0 : i32, i32
  }
  func.func @transform_5(%arg0: i32) -> (i32, i32) {
    %c0_i32 = arith.constant 0 : i32
    %c0_i32_0 = arith.constant 0 : i32
    return %c0_i32, %arg0 : i32, i32
  }
}

</mosaic_0001>

<bundles_post_ra>
// kernel: tpu_custom_call.1
= control target key start
LH: loop header
LB: loop body
LE: loop exit
PB: predicated region body
PF: predicated region fallthrough
CT: control target
= control target key end

     0   :  { %vm50_vm0 = vcmask 64512   ;;  %v343_v5 = vmov 0   ;;  %s427_s0 = inlined_call_operand.vmem [shape: f32[8,32], index: 0, kind: input, shape index: {}]   ;;  %s428_s1 = inlined_call_operand.vmem [shape: f32[32,8], index: 1, kind: input, shape index: {}]   ;;  %s429_s2 = inlined_call_operand.vmem [shape: f32[32,1], index: 2, kind: input, shape index: {}]   ;;  %s430_s3 = inlined_call_operand.vmem [shape: f32[8,32], index: 3, kind: input, shape index: {}]   ;;  %s431_s4 = inlined_call_operand.vmem [shape: f32[8,1], index: 4, kind: input, shape index: {}]   ;;  %s432_s5 = inlined_call_operand.hbm [shape: f32[8,32], index: 5, kind: output, shape index: {}]  }
   0x1   :  { %v21_v0 = vld [vmem:[%s427_s0] sm:$0xff]  ;;  %v23_v2 = vld [vmem:[%s428_s1 + $0x8] sm:$0xff]  ;;  %v24_v3 = vld [vmem:[%s428_s1 + $0x10] sm:$0xff]  ;;  %309 = vset.pattern.permute.xlu0 %v343_v5 }
   0x2   :  { %v22_v1 = vld [vmem:[%s428_s1] sm:$0xff]  ;;  %279 = vmatprep.subr.mxu0 %v21_v0  ;;  %v28_v6 = vld [vmem:[%s429_s2 + $0x10] sm:$0xff] }
   0x3   :  { %281 = vmatprep.mubr.msk.f32.mxu0 %vm50_vm0, %v22_v1  ;;  %v26_v4 = vld [vmem:[%s429_s2] sm:$0xff]  ;;  %280 = vmatpush3.msra.mxu0 %v21_v0 }
   0x4   :  { %282 = vmatmul.mubr.msk.f32.vlgmr.msra.gmra.mrb[0].mxu0 %vm50_vm0, %v23_v2  ;;  %32 = vperm.xlu0 %309, %v26_v4  }
   0x5   :  { %10 = vsyncpa [#allocation3], 0  ;;  %284 = vmatprep.mubr.msk.f32.mxu0 %vm50_vm0, %v24_v3  ;;  %v25_v7 = vld [vmem:[%s428_s1 + $0x18] sm:$0xff]  ;;  %v27_v8 = vld [vmem:[%s429_s2 + $0x8] sm:$0xff]  ;;  %310 = vset.pattern.permute.xlu1 %v343_v5  ;;  %v344_v11 = vmov 0.0|0.0   ;;  %vm345_vm1 = vmmov 0  }
   0x6   :  { %42 = vperm.xlu1 %310, %v28_v6   ;;  %v29_v9 = vld [vmem:[%s429_s2 + $0x18] sm:$0xff]  ;;  %v169_v10 = vld [vmem:[%s431_s4] sm:$0xff]  ;;  %298 = vmatprep.subr.bf16.mxu1 %v344_v11  ;;  %v346_v12 = vmov 0.0   ;;  %vm175_vm2 = vcmask 261120   ;;  %s347_s4 = smov [#allocation2]  }
   0x7   :  { %295 = vmatprep.mubr.msk.f32.mxu1 %vm345_vm1, %v346_v12  ;;  %v168_v47 = vld [vmem:[%s430_s3] sm:$0xff]  ;;  %s256_s12 = sshll.u32 %s347_s4, 4  ;;  %s257_s12 = int_to_ptr.vmem [resolvable:$true] %s256_s12 }
   0x8   :  { %285 = vmatmul.mubr.msk.f32.gmra.mrb[2].mxu0 %vm50_vm0, %v25_v7  ;;  %37 = vperm.xlu0 %309, %v27_v8   ;;  %s319_s13 = scalar_lea.vmem %s257_s12, 128  ;;  %p324_p1 = scmp.lt.s32.totalorder %s257_s12, %s257_s12 }
   0x9   :  { %p320_p0 = scmp.ne.s32.totalorder %s257_s12, %s319_s13  ;;  %p325_p2 = scmp.lt.s32.totalorder %s319_s13, %s319_s13 }
   0xa   :  { %47 = vperm.xlu1 %310, %v29_v9  }
   0xb   :  { %p326_p3 = por %p325_p2, %p324_p1 }
   0xc   :  { %172 = vperm.xlu0 %309, %v169_v10  }
   0xd   :  { %p327_p4 = pnand %p326_p3, %p320_p0 }
  0x83   :  { %v33_v13 = vpop.permute.xlu0 %32 }
  0x85   :  { %v43_v14 = vpop.permute.xlu1 %42 }
  0x87   :  { %v38_v15 = vpop.permute.xlu0 %37 }
  0x89   :  { %v48_v21 = vpop.permute.xlu1 %47 }
  0x8b   :  { %v173_v48 = vpop.permute.xlu0 %172 }
  0xd7   :  { %v283_v16 = vpop.f32.mrb[0].mxu0 }
  0xd8   :  { %v135_v17 = vadd.f32 %v283_v16, %v38_v15  ;;  %v129_v18 = vpop.f32.mrb[1].mxu0 }
  0xd9   :  { %v130_v19 = vadd.f32 %v129_v18, %v33_v13 }
  0xda   :  { %v153_v20 = vmul.f32 0.70710677, %v135_v17  ;;  %v149_v31 = vmul.f32 0.5, %v135_v17 }
  0xdb   :  { %v152_v22 = vmul.f32 0.70710677, %v130_v19  ;;  %v286_v23 = vpop.f32.mrb[2].mxu0  ;;  %v148_v33 = vmul.f32 0.5, %v130_v19 }
  0xdc   :  { %311 = verf.f32 %v153_v20  ;;  %v145_v24 = vadd.f32 %v286_v23, %v48_v21  ;;  %v139_v25 = vpop.f32.mrb[3].mxu0 }
  0xdd   :  { %313 = verf.f32 %v152_v22  ;;  %v140_v26 = vadd.f32 %v139_v25, %v43_v14 }
  0xde   :  { %v155_v27 = vmul.f32 0.70710677, %v145_v24  ;;  %v151_v39 = vmul.f32 0.5, %v145_v24 }
  0xdf   :  { %v154_v28 = vmul.f32 0.70710677, %v140_v26  ;;  %v150_v41 = vmul.f32 0.5, %v140_v26 }
  0xe0   :  { %315 = verf.f32 %v155_v27 }
  0xe1   :  { %317 = verf.f32 %v154_v28 }
  0xe6   :  { %v312_v29 = vpop.eup %311 }
  0xe7   :  { %v314_v30 = vpop.eup %313  ;;  %v161_v32 = vadd.f32 1.0, %v312_v29 }
  0xe8   :  { %v160_v34 = vadd.f32 1.0, %v314_v30 }
  0xe9   :  { %v165_v35 = vmul.f32 %v161_v32, %v149_v31 }
  0xea   :  { %v316_v36 = vpop.eup %315  ;;  %v164_v37 = vmul.f32 %v160_v34, %v148_v33 }
  0xeb   :  { %v318_v38 = vpop.eup %317  ;;  %v163_v40 = vadd.f32 1.0, %v316_v36 }
  0xec   :  { %v162_v42 = vadd.f32 1.0, %v318_v38  ;;  %v299_v43 = vpack.c.bf16 %v165_v35, %v164_v37 }
  0xed   :  { %v167_v44 = vmul.f32 %v163_v40, %v151_v39 }
  0xee   :  { %v166_v45 = vmul.f32 %v162_v42, %v150_v41  ;;  %300 = vmatpush3.bf16.msra.mxu1 %v299_v43 }
  0xef   :  { %301 = vmatprep.subr.bf16.mxu1 %v344_v11 }
  0xf0   :  { %v302_v46 = vpack.c.bf16 %v167_v44, %v166_v45 }
  0xf2   :  { %303 = vmatpush3.bf16.msra.mxu1 %v302_v46 }
  0xf5   :  { %296 = vmatmul.mubr.msk.f32.vlgmr.msra.gmra.mrb[0].mxu1 %vm175_vm2, %v168_v47 }
 0x1c8   :  { %v245_v49 = vpop.f32.mrb[0].mxu1 }
 0x1c9   :  { %v246_v50 = vadd.f32 %v245_v49, %v173_v48  ;;  %v297_v51 = vpop.f32.mrb[1].mxu1 }
 0x1cb   :  { %249 = vst.msk [vmem:[#allocation2] sm:$0xff] %vm175_vm2, %v246_v50 }
 0x1cc   :  { %330 = shalt.err (!%p327_p4)
}
 0x1cd   :  { %s331_s3 = scalar_lea.hbm %s432_s5, 128 }
 0x1ce   :  { %p332_p5 = scmp.ne.s32.totalorder %s432_s5, %s331_s3  ;;  %p335_p6 = scmp.lt.u32.totalorder %s331_s3, %s432_s5 }
 0x1d0   :  { %p337_p7 = pnand %p335_p6, %p332_p5 }
 0x1d2   :  { %340 = shalt.err (!%p337_p7)
}
 0x1d3   :  { %259 = dma.vmem_to_hbm [thread:$0]  %s257_s12, 128, %s432_s5, [#allocation3]  }
 0x1d4   :  { %341 = dma.done.wait [#allocation3], 128  }
 0x1d5   :  { %342 = vsyncadd [#allocation3], 4294967168 }
 0x1d6   :  { %263 = vsyncpa [#allocation3], 1 }

// kernel: tpu_custom_call.1
= control target key start
LH: loop header
LB: loop body
LE: loop exit
PB: predicated region body
PF: predicated region fallthrough
CT: control target
= control target key end

     0   :  { %vm50_vm0 = vcmask 64512   ;;  %v343_v5 = vmov 0   ;;  %s427_s0 = inlined_call_operand.vmem [shape: f32[8,32], index: 0, kind: input, shape index: {}]   ;;  %s428_s1 = inlined_call_operand.vmem [shape: f32[32,8], index: 1, kind: input, shape index: {}]   ;;  %s429_s2 = inlined_call_operand.vmem [shape: f32[32,1], index: 2, kind: input, shape index: {}]   ;;  %s430_s3 = inlined_call_operand.vmem [shape: f32[8,32], index: 3, kind: input, shape index: {}]   ;;  %s431_s4 = inlined_call_operand.vmem [shape: f32[8,1], index: 4, kind: input, shape index: {}]   ;;  %s432_s5 = inlined_call_operand.hbm [shape: f32[8,32], index: 5, kind: output, shape index: {}]  }
   0x1   :  { %v21_v0 = vld [vmem:[%s427_s0] sm:$0xff]  ;;  %v23_v2 = vld [vmem:[%s428_s1 + $0x8] sm:$0xff]  ;;  %v24_v3 = vld [vmem:[%s428_s1 + $0x10] sm:$0xff]  ;;  %309 = vset.pattern.permute.xlu0 %v343_v5 }
   0x2   :  { %v22_v1 = vld [vmem:[%s428_s1] sm:$0xff]  ;;  %279 = vmatprep.subr.mxu0 %v21_v0  ;;  %v28_v6 = vld [vmem:[%s429_s2 + $0x10] sm:$0xff] }
   0x3   :  { %281 = vmatprep.mubr.msk.f32.mxu0 %vm50_vm0, %v22_v1  ;;  %v26_v4 = vld [vmem:[%s429_s2] sm:$0xff]  ;;  %280 = vmatpush3.msra.mxu0 %v21_v0 }
   0x4   :  { %282 = vmatmul.mubr.msk.f32.vlgmr.msra.gmra.mrb[0].mxu0 %vm50_vm0, %v23_v2  ;;  %32 = vperm.xlu0 %309, %v26_v4  }
   0x5   :  { %10 = vsyncpa [#allocation3], 0  ;;  %284 = vmatprep.mubr.msk.f32.mxu0 %vm50_vm0, %v24_v3  ;;  %v25_v7 = vld [vmem:[%s428_s1 + $0x18] sm:$0xff]  ;;  %v27_v8 = vld [vmem:[%s429_s2 + $0x8] sm:$0xff]  ;;  %310 = vset.pattern.permute.xlu1 %v343_v5  ;;  %v344_v11 = vmov 0.0|0.0   ;;  %vm345_vm1 = vmmov 0  }
   0x6   :  { %42 = vperm.xlu1 %310, %v28_v6   ;;  %v29_v9 = vld [vmem:[%s429_s2 + $0x18] sm:$0xff]  ;;  %v169_v10 = vld [vmem:[%s431_s4] sm:$0xff]  ;;  %298 = vmatprep.subr.bf16.mxu1 %v344_v11  ;;  %v346_v12 = vmov 0.0   ;;  %vm175_vm2 = vcmask 261120   ;;  %s347_s4 = smov [#allocation2]  }
   0x7   :  { %295 = vmatprep.mubr.msk.f32.mxu1 %vm345_vm1, %v346_v12  ;;  %v168_v47 = vld [vmem:[%s430_s3] sm:$0xff]  ;;  %s256_s12 = sshll.u32 %s347_s4, 4  ;;  %s257_s12 = int_to_ptr.vmem [resolvable:$true] %s256_s12 }
   0x8   :  { %285 = vmatmul.mubr.msk.f32.gmra.mrb[2].mxu0 %vm50_vm0, %v25_v7  ;;  %37 = vperm.xlu0 %309, %v27_v8   ;;  %s319_s13 = scalar_lea.vmem %s257_s12, 128  ;;  %p324_p1 = scmp.lt.s32.totalorder %s257_s12, %s257_s12 }
   0x9   :  { %p320_p0 = scmp.ne.s32.totalorder %s257_s12, %s319_s13  ;;  %p325_p2 = scmp.lt.s32.totalorder %s319_s13, %s319_s13 }
   0xa   :  { %47 = vperm.xlu1 %310, %v29_v9  }
   0xb   :  { %p326_p3 = por %p325_p2, %p324_p1 }
   0xc   :  { %172 = vperm.xlu0 %309, %v169_v10  }
   0xd   :  { %p327_p4 = pnand %p326_p3, %p320_p0 }
  0x83   :  { %v33_v13 = vpop.permute.xlu0 %32 }
  0x85   :  { %v43_v14 = vpop.permute.xlu1 %42 }
  0x87   :  { %v38_v15 = vpop.permute.xlu0 %37 }
  0x89   :  { %v48_v21 = vpop.permute.xlu1 %47 }
  0x8b   :  { %v173_v48 = vpop.permute.xlu0 %172 }
  0xd7   :  { %v283_v16 = vpop.f32.mrb[0].mxu0 }
  0xd8   :  { %v135_v17 = vadd.f32 %v283_v16, %v38_v15  ;;  %v129_v18 = vpop.f32.mrb[1].mxu0 }
  0xd9   :  { %v130_v19 = vadd.f32 %v129_v18, %v33_v13 }
  0xda   :  { %v153_v20 = vmul.f32 0.70710677, %v135_v17  ;;  %v149_v31 = vmul.f32 0.5, %v135_v17 }
  0xdb   :  { %v152_v22 = vmul.f32 0.70710677, %v130_v19  ;;  %v286_v23 = vpop.f32.mrb[2].mxu0  ;;  %v148_v33 = vmul.f32 0.5, %v130_v19 }
  0xdc   :  { %311 = verf.f32 %v153_v20  ;;  %v145_v24 = vadd.f32 %v286_v23, %v48_v21  ;;  %v139_v25 = vpop.f32.mrb[3].mxu0 }
  0xdd   :  { %313 = verf.f32 %v152_v22  ;;  %v140_v26 = vadd.f32 %v139_v25, %v43_v14 }
  0xde   :  { %v155_v27 = vmul.f32 0.70710677, %v145_v24  ;;  %v151_v39 = vmul.f32 0.5, %v145_v24 }
  0xdf   :  { %v154_v28 = vmul.f32 0.70710677, %v140_v26  ;;  %v150_v41 = vmul.f32 0.5, %v140_v26 }
  0xe0   :  { %315 = verf.f32 %v155_v27 }
  0xe1   :  { %317 = verf.f32 %v154_v28 }
  0xe6   :  { %v312_v29 = vpop.eup %311 }
  0xe7   :  { %v314_v30 = vpop.eup %313  ;;  %v161_v32 = vadd.f32 1.0, %v312_v29 }
  0xe8   :  { %v160_v34 = vadd.f32 1.0, %v314_v30 }
  0xe9   :  { %v165_v35 = vmul.f32 %v161_v32, %v149_v31 }
  0xea   :  { %v316_v36 = vpop.eup %315  ;;  %v164_v37 = vmul.f32 %v160_v34, %v148_v33 }
  0xeb   :  { %v318_v38 = vpop.eup %317  ;;  %v163_v40 = vadd.f32 1.0, %v316_v36 }
  0xec   :  { %v162_v42 = vadd.f32 1.0, %v318_v38  ;;  %v299_v43 = vpack.c.bf16 %v165_v35, %v164_v37 }
  0xed   :  { %v167_v44 = vmul.f32 %v163_v40, %v151_v39 }
  0xee   :  { %v166_v45 = vmul.f32 %v162_v42, %v150_v41  ;;  %300 = vmatpush3.bf16.msra.mxu1 %v299_v43 }
  0xef   :  { %301 = vmatprep.subr.bf16.mxu1 %v344_v11 }
  0xf0   :  { %v302_v46 = vpack.c.bf16 %v167_v44, %v166_v45 }
  0xf2   :  { %303 = vmatpush3.bf16.msra.mxu1 %v302_v46 }
  0xf5   :  { %296 = vmatmul.mubr.msk.f32.vlgmr.msra.gmra.mrb[0].mxu1 %vm175_vm2, %v168_v47 }
 0x1c8   :  { %v245_v49 = vpop.f32.mrb[0].mxu1 }
 0x1c9   :  { %v246_v50 = vadd.f32 %v245_v49, %v173_v48  ;;  %v297_v51 = vpop.f32.mrb[1].mxu1 }
 0x1cb   :  { %249 = vst.msk [vmem:[#allocation2] sm:$0xff] %vm175_vm2, %v246_v50 }
 0x1cc   :  { %330 = shalt.err (!%p327_p4)
}
 0x1cd   :  { %s331_s3 = scalar_lea.hbm %s432_s5, 128 }
 0x1ce   :  { %p332_p5 = scmp.ne.s32.totalorder %s432_s5, %s331_s3  ;;  %p335_p6 = scmp.lt.u32.totalorder %s331_s3, %s432_s5 }
 0x1d0   :  { %p337_p7 = pnand %p335_p6, %p332_p5 }
 0x1d2   :  { %340 = shalt.err (!%p337_p7)
}
 0x1d3   :  { %259 = dma.vmem_to_hbm [thread:$0]  %s257_s12, 128, %s432_s5, [#allocation3]  }
 0x1d4   :  { %341 = dma.done.wait [#allocation3], 128  }
 0x1d5   :  { %342 = vsyncadd [#allocation3], 4294967168 }
 0x1d6   :  { %263 = vsyncpa [#allocation3], 1 }

</bundles_post_ra>
